<compile_context>
chip_gen: v7x
topology: tpu7x:2x2x1
jax: 0.10.0
libtpu: 0.0.40
codegen_flags: <defaults>
</compile_context>

<pallas_src>
import jax
import jax.numpy as jnp
from jax import lax
from jax.experimental import pallas as pl
from jax.experimental.pallas import tpu as pltpu

INPUT_SIZE = 1
HIDDEN_SIZE = 50
OUTPUT_SIZE = 1

_LANE = 128      # lane width (last dim tile)
_SUBLANE = 8     # sublane width (second-last dim tile)
_MAX_BATCH_BLOCK = 64   # keeps h / xproj / W_hh^T vreg footprint under 64 vregs


def _round_up(v, m):
    return ((v + m - 1) // m) * m


def rnn_kernel(xproj_ref, whh_ref, wfc_ref, bfc_ref, out_ref):
    # xproj_ref: (T, BB, Hp)  precomputed x_t @ W_ih^T + (b_ih + b_hh), zero-padded
    # whh_ref  : (Hp, Hp)     W_hh^T, zero-padded
    # wfc_ref  : (1, Hp)      fc weight row (O=1), zero-padded
    # bfc_ref  : (1, 1)       fc bias
    # out_ref  : (BB, 1)
    T, BB, Hp = xproj_ref.shape

    whh = whh_ref[...]  # hoisted: 128x128 f32 lives in vregs across the whole loop

    def step(t, h):
        # Plain vld from the time-major VMEM buffer, one 8x128 @ 128x128 MXU op,
        # tanh on the EUP.  Pad lanes/rows stay exactly zero: tanh(0 + 0) == 0.
        return jnp.tanh(
            xproj_ref[t] + jnp.dot(h, whh, preferred_element_type=jnp.float32)
        )

    h0 = jnp.zeros((BB, Hp), dtype=jnp.float32)
    hT = lax.fori_loop(0, T, step, h0, unroll=True)  # T is static -> fully unrolled

    # fc head (O=1): VPU multiply + XLU lane reduction instead of an N=1 MXU matmul.
    # Zero-padded wfc lanes (H..Hp) contribute nothing.
    y = jnp.sum(hT * wfc_ref[...], axis=-1, keepdims=True) + bfc_ref[...]
    out_ref[...] = y.astype(out_ref.dtype)


def simple_rnn_forward(x, params):
    """x: (B, T, I) float32 -> (B, O) float32 (same semantics as SimpleRNN.forward)."""
    B, T, I = x.shape
    H = params["w_hh"].shape[0]
    O = params["w_fc"].shape[0]
    assert I == INPUT_SIZE and O == OUTPUT_SIZE

    Hp = _round_up(H, _LANE)                       # 50 -> 128 lanes
    B8 = _round_up(B, _SUBLANE)                    # 4 -> 8 sublanes
    BB = min(B8, _MAX_BATCH_BLOCK)                 # batch tile per grid step
    Bp = _round_up(B, BB)                          # padded batch

    # Hoisted input projection: one matmul over all (b, t) + combined RNN bias.
    bias = params["b_ih"] + params["b_hh"]                                   # (H,)
    xproj = jnp.einsum("bti,hi->tbh", x, params["w_ih"]) + bias              # (T, B, H)

    # Zero-pad everything to hardware tiles (pad lanes/rows strictly zero).
    xproj_p = jnp.zeros((T, Bp, Hp), jnp.float32).at[:, :B, :H].set(xproj)
    whh_p = jnp.zeros((Hp, Hp), jnp.float32).at[:H, :H].set(params["w_hh"].T)
    wfc_p = jnp.zeros((1, Hp), jnp.float32).at[:, :H].set(params["w_fc"])
    bfc = params["b_fc"].reshape(1, 1).astype(jnp.float32)

    cost = pl.CostEstimate(
        flops=2 * T * Bp * Hp * Hp + 3 * Bp * Hp,
        transcendentals=T * Bp * Hp,
        bytes_accessed=4 * (T * Bp * Hp + Hp * Hp + Hp + 1 + Bp),
    )

    out_p = pl.pallas_call(
        rnn_kernel,
        out_shape=jax.ShapeDtypeStruct((Bp, OUTPUT_SIZE), jnp.float32),
        grid=(Bp // BB,),
        in_specs=[
            pl.BlockSpec((T, BB, Hp), lambda i: (0, i, 0)),   # time-major xproj, batch-tiled
            pl.BlockSpec((Hp, Hp), lambda i: (0, 0)),         # W_hh^T (shared)
            pl.BlockSpec((1, Hp), lambda i: (0, 0)),          # fc weight row (shared)
            pl.BlockSpec((1, 1), lambda i: (0, 0)),           # fc bias (shared)
        ],
        out_specs=pl.BlockSpec((BB, OUTPUT_SIZE), lambda i: (i, 0)),
        compiler_params=pltpu.CompilerParams(
            dimension_semantics=("parallel",),                # batch is embarrassingly parallel
        ),
        cost_estimate=cost,
    )(xproj_p, whh_p, wfc_p, bfc)

    return out_p[:B]


def init_params(key):
    # Deterministic init mimicking PyTorch's U(-1/sqrt(H), 1/sqrt(H)).
    k = 1.0 / jnp.sqrt(jnp.float32(HIDDEN_SIZE))
    keys = jax.random.split(key, 6)
    u = lambda kk, shape: jax.random.uniform(kk, shape, jnp.float32, -k, k)
    return {
        "w_ih": u(keys[0], (HIDDEN_SIZE, INPUT_SIZE)),   # rnn.weight_ih_l0
        "w_hh": u(keys[1], (HIDDEN_SIZE, HIDDEN_SIZE)),  # rnn.weight_hh_l0
        "b_ih": u(keys[2], (HIDDEN_SIZE,)),              # rnn.bias_ih_l0
        "b_hh": u(keys[3], (HIDDEN_SIZE,)),              # rnn.bias_hh_l0
        "w_fc": u(keys[4], (OUTPUT_SIZE, HIDDEN_SIZE)),  # fc.weight
        "b_fc": u(keys[5], (OUTPUT_SIZE,)),              # fc.bias
    }


def reference_forward(x, params):
    # Pure-JAX reference of the PyTorch forward (un-padded, per-step projection).
    B, T, _ = x.shape
    h = jnp.zeros((B, HIDDEN_SIZE), jnp.float32)
    for t in range(T):
        h = jnp.tanh(x[:, t, :] @ params["w_ih"].T + params["b_ih"]
                     + h @ params["w_hh"].T + params["b_hh"])
    return h @ params["w_fc"].T + params["b_fc"]


if __name__ == "__main__":
    key = jax.random.PRNGKey(0)
    kx, kp = jax.random.split(key)

    batch, seq = 4, 8
    x = jax.random.normal(kx, (batch, seq, INPUT_SIZE), dtype=jnp.float32)
    params = init_params(kp)

    out = simple_rnn_forward(x, params)
    out = jax.block_until_ready(out)

    ref = reference_forward(x, params)
    assert out.shape == (batch, OUTPUT_SIZE)
    assert jnp.allclose(out, ref, atol=1e-5, rtol=1e-5)
    print("KERNEL_OK")
</pallas_src>

<mosaic_0001>
module attributes {stable_mosaic.version = 11 : i64} {
  func.func @rnn_kernel(%arg0: i32, %arg1: memref<8x8x128xf32, #tpu.memory_space<vmem>>, %arg2: memref<128x128xf32, #tpu.memory_space<vmem>>, %arg3: memref<1x128xf32, #tpu.memory_space<vmem>>, %arg4: memref<1x1xf32, #tpu.memory_space<vmem>>, %arg5: memref<8x1xf32, #tpu.memory_space<vmem>>) attributes {dimension_semantics = [#tpu.dimension_semantics<parallel>], iteration_bounds = array<i64: 1>, scalar_prefetch = 0 : i64, scratch_operands = 0 : i64, tpu.core_type = #tpu.core_type<tc>, window_params = [{transform_indices = @transform_0, window_bounds = array<i64: 8, 8, 128>}, {pipeline_mode = #tpu.pipeline_mode<synchronous>, transform_indices = @transform_1, window_bounds = array<i64: 128, 128>}, {pipeline_mode = #tpu.pipeline_mode<synchronous>, transform_indices = @transform_2, window_bounds = array<i64: 1, 128>}, {pipeline_mode = #tpu.pipeline_mode<synchronous>, transform_indices = @transform_3, window_bounds = array<i64: 1, 1>}, {transform_indices = @transform_4, window_bounds = array<i64: 8, 1>}]} {
    %c0 = arith.constant 0 : index
    %c0_0 = arith.constant 0 : index
    %0 = vector.load %arg2[%c0, %c0_0] : memref<128x128xf32, #tpu.memory_space<vmem>>, vector<128x128xf32>
    %cst = arith.constant 0.000000e+00 : f32
    %1 = vector.broadcast %cst : f32 to vector<8x128xf32>
    %c0_i32 = arith.constant 0 : i32
    %2 = arith.index_cast %c0_i32 : i32 to index
    %c0_1 = arith.constant 0 : index
    %c0_2 = arith.constant 0 : index
    %3 = vector.load %arg1[%2, %c0_1, %c0_2] : memref<8x8x128xf32, #tpu.memory_space<vmem>>, vector<1x8x128xf32>
    %4 = vector.shape_cast %3 : vector<1x8x128xf32> to vector<8x128xf32>
    %cst_3 = arith.constant dense<0.000000e+00> : vector<8x128xf32>
    %5 = tpu.matmul %1, %0, %cst_3 {dimension_numbers = #tpu.dot_dimension_numbers<[1], [0], [0], [1], [0, 0, 1, 1], [], []>} : vector<8x128xf32>, vector<128x128xf32>, vector<8x128xf32> -> vector<8x128xf32>
    %6 = arith.addf %4, %5 : vector<8x128xf32>
    %7 = math.tanh %6 : vector<8x128xf32>
    %c1_i32 = arith.constant 1 : i32
    %8 = arith.index_cast %c1_i32 : i32 to index
    %c0_4 = arith.constant 0 : index
    %c0_5 = arith.constant 0 : index
    %9 = vector.load %arg1[%8, %c0_4, %c0_5] : memref<8x8x128xf32, #tpu.memory_space<vmem>>, vector<1x8x128xf32>
    %10 = vector.shape_cast %9 : vector<1x8x128xf32> to vector<8x128xf32>
    %cst_6 = arith.constant dense<0.000000e+00> : vector<8x128xf32>
    %11 = tpu.matmul %7, %0, %cst_6 {dimension_numbers = #tpu.dot_dimension_numbers<[1], [0], [0], [1], [0, 0, 1, 1], [], []>} : vector<8x128xf32>, vector<128x128xf32>, vector<8x128xf32> -> vector<8x128xf32>
    %12 = arith.addf %10, %11 : vector<8x128xf32>
    %13 = math.tanh %12 : vector<8x128xf32>
    %c2_i32 = arith.constant 2 : i32
    %14 = arith.index_cast %c2_i32 : i32 to index
    %c0_7 = arith.constant 0 : index
    %c0_8 = arith.constant 0 : index
    %15 = vector.load %arg1[%14, %c0_7, %c0_8] : memref<8x8x128xf32, #tpu.memory_space<vmem>>, vector<1x8x128xf32>
    %16 = vector.shape_cast %15 : vector<1x8x128xf32> to vector<8x128xf32>
    %cst_9 = arith.constant dense<0.000000e+00> : vector<8x128xf32>
    %17 = tpu.matmul %13, %0, %cst_9 {dimension_numbers = #tpu.dot_dimension_numbers<[1], [0], [0], [1], [0, 0, 1, 1], [], []>} : vector<8x128xf32>, vector<128x128xf32>, vector<8x128xf32> -> vector<8x128xf32>
    %18 = arith.addf %16, %17 : vector<8x128xf32>
    %19 = math.tanh %18 : vector<8x128xf32>
    %c3_i32 = arith.constant 3 : i32
    %20 = arith.index_cast %c3_i32 : i32 to index
    %c0_10 = arith.constant 0 : index
    %c0_11 = arith.constant 0 : index
    %21 = vector.load %arg1[%20, %c0_10, %c0_11] : memref<8x8x128xf32, #tpu.memory_space<vmem>>, vector<1x8x128xf32>
    %22 = vector.shape_cast %21 : vector<1x8x128xf32> to vector<8x128xf32>
    %cst_12 = arith.constant dense<0.000000e+00> : vector<8x128xf32>
    %23 = tpu.matmul %19, %0, %cst_12 {dimension_numbers = #tpu.dot_dimension_numbers<[1], [0], [0], [1], [0, 0, 1, 1], [], []>} : vector<8x128xf32>, vector<128x128xf32>, vector<8x128xf32> -> vector<8x128xf32>
    %24 = arith.addf %22, %23 : vector<8x128xf32>
    %25 = math.tanh %24 : vector<8x128xf32>
    %c4_i32 = arith.constant 4 : i32
    %26 = arith.index_cast %c4_i32 : i32 to index
    %c0_13 = arith.constant 0 : index
    %c0_14 = arith.constant 0 : index
    %27 = vector.load %arg1[%26, %c0_13, %c0_14] : memref<8x8x128xf32, #tpu.memory_space<vmem>>, vector<1x8x128xf32>
    %28 = vector.shape_cast %27 : vector<1x8x128xf32> to vector<8x128xf32>
    %cst_15 = arith.constant dense<0.000000e+00> : vector<8x128xf32>
    %29 = tpu.matmul %25, %0, %cst_15 {dimension_numbers = #tpu.dot_dimension_numbers<[1], [0], [0], [1], [0, 0, 1, 1], [], []>} : vector<8x128xf32>, vector<128x128xf32>, vector<8x128xf32> -> vector<8x128xf32>
    %30 = arith.addf %28, %29 : vector<8x128xf32>
    %31 = math.tanh %30 : vector<8x128xf32>
    %c5_i32 = arith.constant 5 : i32
    %32 = arith.index_cast %c5_i32 : i32 to index
    %c0_16 = arith.constant 0 : index
    %c0_17 = arith.constant 0 : index
    %33 = vector.load %arg1[%32, %c0_16, %c0_17] : memref<8x8x128xf32, #tpu.memory_space<vmem>>, vector<1x8x128xf32>
    %34 = vector.shape_cast %33 : vector<1x8x128xf32> to vector<8x128xf32>
    %cst_18 = arith.constant dense<0.000000e+00> : vector<8x128xf32>
    %35 = tpu.matmul %31, %0, %cst_18 {dimension_numbers = #tpu.dot_dimension_numbers<[1], [0], [0], [1], [0, 0, 1, 1], [], []>} : vector<8x128xf32>, vector<128x128xf32>, vector<8x128xf32> -> vector<8x128xf32>
    %36 = arith.addf %34, %35 : vector<8x128xf32>
    %37 = math.tanh %36 : vector<8x128xf32>
    %c6_i32 = arith.constant 6 : i32
    %38 = arith.index_cast %c6_i32 : i32 to index
    %c0_19 = arith.constant 0 : index
    %c0_20 = arith.constant 0 : index
    %39 = vector.load %arg1[%38, %c0_19, %c0_20] : memref<8x8x128xf32, #tpu.memory_space<vmem>>, vector<1x8x128xf32>
    %40 = vector.shape_cast %39 : vector<1x8x128xf32> to vector<8x128xf32>
    %cst_21 = arith.constant dense<0.000000e+00> : vector<8x128xf32>
    %41 = tpu.matmul %37, %0, %cst_21 {dimension_numbers = #tpu.dot_dimension_numbers<[1], [0], [0], [1], [0, 0, 1, 1], [], []>} : vector<8x128xf32>, vector<128x128xf32>, vector<8x128xf32> -> vector<8x128xf32>
    %42 = arith.addf %40, %41 : vector<8x128xf32>
    %43 = math.tanh %42 : vector<8x128xf32>
    %c7_i32 = arith.constant 7 : i32
    %44 = arith.index_cast %c7_i32 : i32 to index
    %c0_22 = arith.constant 0 : index
    %c0_23 = arith.constant 0 : index
    %45 = vector.load %arg1[%44, %c0_22, %c0_23] : memref<8x8x128xf32, #tpu.memory_space<vmem>>, vector<1x8x128xf32>
    %46 = vector.shape_cast %45 : vector<1x8x128xf32> to vector<8x128xf32>
    %cst_24 = arith.constant dense<0.000000e+00> : vector<8x128xf32>
    %47 = tpu.matmul %43, %0, %cst_24 {dimension_numbers = #tpu.dot_dimension_numbers<[1], [0], [0], [1], [0, 0, 1, 1], [], []>} : vector<8x128xf32>, vector<128x128xf32>, vector<8x128xf32> -> vector<8x128xf32>
    %48 = arith.addf %46, %47 : vector<8x128xf32>
    %49 = math.tanh %48 : vector<8x128xf32>
    %c8_i32 = arith.constant 8 : i32
    %c0_25 = arith.constant 0 : index
    %c0_26 = arith.constant 0 : index
    %50 = vector.load %arg3[%c0_25, %c0_26] : memref<1x128xf32, #tpu.memory_space<vmem>>, vector<1x128xf32>
    %51 = vector.broadcast %50 : vector<1x128xf32> to vector<8x128xf32>
    %52 = arith.mulf %49, %51 : vector<8x128xf32>
    %cst_27 = arith.constant dense<0.000000e+00> : vector<8xf32>
    %53 = vector.multi_reduction <add>, %52, %cst_27 [1] : vector<8x128xf32> to vector<8xf32>
    %54 = vector.shape_cast %53 : vector<8xf32> to vector<8x1xf32>
    %c0_28 = arith.constant 0 : index
    %c0_29 = arith.constant 0 : index
    %55 = vector.load %arg4[%c0_28, %c0_29] : memref<1x1xf32, #tpu.memory_space<vmem>>, vector<1x1xf32>
    %56 = vector.broadcast %55 : vector<1x1xf32> to vector<8x1xf32>
    %57 = arith.addf %54, %56 : vector<8x1xf32>
    %c0_30 = arith.constant 0 : index
    %c0_31 = arith.constant 0 : index
    %58 = vector.load %arg5[%c0_30, %c0_31] : memref<8x1xf32, #tpu.memory_space<vmem>>, vector<8x1xf32>
    tpu.vector_store %arg5[%c0_30, %c0_31], %57 {strides = array<i32>} : memref<8x1xf32, #tpu.memory_space<vmem>>, vector<8x1xf32>,
    return
  }
  func.func @transform_0(%arg0: i32) -> (i32, i32, i32) {
    %c0_i32 = arith.constant 0 : i32
    %c0_i32_0 = arith.constant 0 : i32
    %c0_i32_1 = arith.constant 0 : i32
    return %c0_i32, %arg0, %c0_i32_0 : i32, i32, i32
  }
  func.func @transform_1(%arg0: i32) -> (i32, i32) {
    %c0_i32 = arith.constant 0 : i32
    %c0_i32_0 = arith.constant 0 : i32
    %c0_i32_1 = arith.constant 0 : i32
    return %c0_i32, %c0_i32_0 : i32, i32
  }
  func.func @transform_2(%arg0: i32) -> (i32, i32) {
    %c0_i32 = arith.constant 0 : i32
    %c0_i32_0 = arith.constant 0 : i32
    %c0_i32_1 = arith.constant 0 : i32
    return %c0_i32, %c0_i32_0 : i32, i32
  }
  func.func @transform_3(%arg0: i32) -> (i32, i32) {
    %c0_i32 = arith.constant 0 : i32
    %c0_i32_0 = arith.constant 0 : i32
    %c0_i32_1 = arith.constant 0 : i32
    return %c0_i32, %c0_i32_0 : i32, i32
  }
  func.func @transform_4(%arg0: i32) -> (i32, i32) {
    %c0_i32 = arith.constant 0 : i32
    %c0_i32_0 = arith.constant 0 : i32
    return %arg0, %c0_i32 : i32, i32
  }
}

</mosaic_0001>

<bundles_post_ra>
// kernel: tpu_custom_call.1
= control target key start
LH: loop header
LB: loop body
LE: loop exit
PB: predicated region body
PF: predicated region fallthrough
CT: control target
= control target key end

     0   :  { %s1587_s0 = inlined_call_operand.hbm [shape: f32[8,8,128], index: 0, kind: input, shape index: {}]   ;;  %s1588_s1 = inlined_call_operand.hbm [shape: f32[128,128], index: 1, kind: input, shape index: {}]   ;;  %s1589_s2 = inlined_call_operand.vmem [shape: f32[1,128], index: 2, kind: input, shape index: {}]   ;;  %s1590_s3 = inlined_call_operand.<no memory space> [shape: f32[1,1], index: 3, kind: input, shape index: {}]   ;;  %s1591_s4 = inlined_call_operand.vmem [shape: f32[8,1], index: 4, kind: output, shape index: {}]  }
   0x1   :  { %v9_v0 = vstv %s1590_s3 }
   0x2   :  { %10 = vst [vmem:[#allocation2] sm:$0x1] %v9_v0 }
   0x3   :  { %11 = vsyncpa [#allocation4], 0 }
   0x4   :  { %12 = vsyncpa [#allocation6], 0  ;;  %s1361_s17 = smov [#allocation3]   ;;  %s1313_s21 = scalar_lea.hbm %s1587_s0, 1024 }
   0x5   :  { %s18_s18 = sshll.u32 %s1361_s17, 4  ;;  %p1314_p0 = scmp.ne.s32.totalorder %s1587_s0, %s1313_s21  ;;  %s19_s18 = int_to_ptr.vmem [resolvable:$true] %s18_s18 }
   0x6   :  { %p1317_p1 = scmp.lt.u32.totalorder %s1313_s21, %s1587_s0 }
   0x8   :  { %p1319_p2 = pnand %p1317_p1, %p1314_p0 }
   0xa   :  { %1322 = shalt.err (!%p1319_p2)
}
   0xb   :  { %s1323_s3 = scalar_lea.vmem %s19_s18, 1024  ;;  %p1328_p4 = scmp.lt.s32.totalorder %s19_s18, %s19_s18 }
   0xc   :  { %p1324_p3 = scmp.ne.s32.totalorder %s19_s18, %s1323_s3  ;;  %p1329_p5 = scmp.lt.s32.totalorder %s1323_s3, %s1323_s3 }
   0xe   :  { %p1330_p6 = por %p1329_p5, %p1328_p4 }
  0x10   :  { %p1331_p7 = pnand %p1330_p6, %p1324_p3 }
  0x12   :  { %1334 = shalt.err (!%p1331_p7)
}
  0x13   :  { %s1362_s26 = smov 128   ;;  %s1363_s27 = smov 8  }
  0x14   :  { %24 = dma.hbm_to_vmem [thread:$0]  %s1587_s0, 1024, %s19_s18, [#allocation4], %s1362_s26, %s1362_s26, %s1363_s27  }
  0x15   :  { %s1364_s30 = smov [#allocation5]   ;;  %s1335_s8 = scalar_lea.hbm %s1588_s1, 2048 }
  0x16   :  { %s30_s5 = sshll.u32 %s1364_s30, 4  ;;  %p1336_p8 = scmp.ne.s32.totalorder %s1588_s1, %s1335_s8  ;;  %s31_s5 = int_to_ptr.vmem [resolvable:$true] %s30_s5 }
  0x17   :  { %p1339_p9 = scmp.lt.u32.totalorder %s1335_s8, %s1588_s1 }
  0x19   :  { %p1341_p10 = pnand %p1339_p9, %p1336_p8 }
  0x1b   :  { %1344 = shalt.err (!%p1341_p10)
}
  0x1c   :  { %s1345_s13 = scalar_lea.vmem %s31_s5, 2048  ;;  %p1350_p12 = scmp.lt.s32.totalorder %s31_s5, %s31_s5 }
  0x1d   :  { %p1346_p11 = scmp.ne.s32.totalorder %s31_s5, %s1345_s13  ;;  %p1351_p13 = scmp.lt.s32.totalorder %s1345_s13, %s1345_s13 }
  0x1f   :  { %p1352_p0 = por %p1351_p13, %p1350_p12 }
  0x21   :  { %p1353_p1 = pnand %p1352_p0, %p1346_p11 }
  0x23   :  { %1356 = shalt.err (!%p1353_p1)
}
  0x24   :  { %36 = dma.hbm_to_vmem [thread:$0]  %s1588_s1, 2048, %s31_s5, [#allocation6], %s1362_s26, %s1362_s26, %s1363_s27  }
  0x25   :  { %1357 = dma.done.wait [#allocation4], 1024  }
  0x26   :  { %1358 = vsyncadd [#allocation4], 4294966272 }
  0x27   :  { %1359 = dma.done.wait [#allocation6], 2048  }
  0x28   :  { %1360 = vsyncadd [#allocation6], 4294965248  ;;  %v1365_v1 = vmov 0.0|0.0   ;;  %vm1366_vm0 = vmmov 0   ;;  %v1367_v2 = vmov 0.0   ;;  %v47_v3 = vld [vmem:[#allocation5] sm:$0xff] }
  0x29   :  { %1098 = vmatprep.subr.bf16.mxu0 %v1365_v1  ;;  %850 = vmatprep.mubr.msk.f32.mxu0 %vm1366_vm0, %v1367_v2  ;;  %v48_v4 = vld [vmem:[#allocation5 + $0x8] sm:$0xff]  ;;  %v49_v5 = vld [vmem:[#allocation5 + $0x10] sm:$0xff]  ;;  %v50_v7 = vld [vmem:[#allocation5 + $0x18] sm:$0xff]  ;;  %vm672_vm1 = vcmask 7168  }
  0x2a   :  { %1122 = vmatprep.subr.bf16.mxu1 %v1365_v1  ;;  %885 = vmatprep.mubr.msk.f32.mxu1 %vm1366_vm0, %v1367_v2  ;;  %v1426_v6 = vpack.c.bf16 %v48_v4, %v47_v3  ;;  %v1429_v8 = vpack.c.bf16 %v50_v7, %v49_v5  ;;  %v51_v9 = vld [vmem:[#allocation5 + $0x20] sm:$0xff]  ;;  %v52_v10 = vld [vmem:[#allocation5 + $0x28] sm:$0xff]  ;;  %v53_v12 = vld [vmem:[#allocation5 + $0x30] sm:$0xff] }
  0x2b   :  { %v1435_v11 = vpack.c.bf16 %v52_v10, %v51_v9  ;;  %v54_v13 = vld [vmem:[#allocation5 + $0x38] sm:$0xff]  ;;  %v55_v15 = vld [vmem:[#allocation5 + $0x40] sm:$0xff]  ;;  %v56_v16 = vld [vmem:[#allocation5 + $0x48] sm:$0xff] }
  0x2c   :  { %1100 = vmatpush3.bf16.msra.mxu0 %v1426_v6  ;;  %1124 = vmatpush3.bf16.msra.mxu1 %v1426_v6  ;;  %v1441_v14 = vpack.c.bf16 %v54_v13, %v53_v12  ;;  %v1447_v17 = vpack.c.bf16 %v56_v16, %v55_v15  ;;  %v57_v18 = vld [vmem:[#allocation5 + $0x50] sm:$0xff]  ;;  %v58_v19 = vld [vmem:[#allocation5 + $0x58] sm:$0xff]  ;;  %v59_v21 = vld [vmem:[#allocation5 + $0x60] sm:$0xff] }
  0x2d   :  { %1101 = vmatprep.subr.bf16.mxu0 %v1365_v1  ;;  %1125 = vmatprep.subr.bf16.mxu1 %v1365_v1  ;;  %v1453_v20 = vpack.c.bf16 %v58_v19, %v57_v18  ;;  %v60_v22 = vld [vmem:[#allocation5 + $0x68] sm:$0xff]  ;;  %v61_v24 = vld [vmem:[#allocation5 + $0x70] sm:$0xff]  ;;  %v62_v25 = vld [vmem:[#allocation5 + $0x78] sm:$0xff] }
  0x2e   :  { %v1459_v23 = vpack.c.bf16 %v60_v22, %v59_v21  ;;  %v1465_v26 = vpack.c.bf16 %v62_v25, %v61_v24  ;;  %v63_v27 = vld [vmem:[#allocation3] sm:$0xff]  ;;  %v137_v32 = vld [vmem:[#allocation3 + $0x8] sm:$0xff]  ;;  %v211_v37 = vld [vmem:[#allocation3 + $0x10] sm:$0xff] }
  0x2f   :  { %v285_v42 = vld [vmem:[#allocation3 + $0x18] sm:$0xff]  ;;  %v359_v47 = vld [vmem:[#allocation3 + $0x20] sm:$0xff]  ;;  %v433_v52 = vld [vmem:[#allocation3 + $0x28] sm:$0xff] }
  0x30   :  { %1103 = vmatpush3.bf16.msra.mxu0 %v1429_v8  ;;  %1127 = vmatpush3.bf16.msra.mxu1 %v1429_v8  ;;  %v507_v57 = vld [vmem:[#allocation3 + $0x30] sm:$0xff]  ;;  %v581_v62 = vld [vmem:[#allocation3 + $0x38] sm:$0xff] }
  0x31   :  { %1104 = vmatprep.subr.bf16.mxu0 %v1365_v1  ;;  %1128 = vmatprep.subr.bf16.mxu1 %v1365_v1  ;;  %v681_v5 = vld [vmem:[#allocation2] ss:$0 sm:$0xff] }
  0x34   :  { %1106 = vmatpush3.bf16.msra.mxu0 %v1435_v11  ;;  %1130 = vmatpush3.bf16.msra.mxu1 %v1435_v11 }
  0x35   :  { %1107 = vmatprep.subr.bf16.mxu0 %v1365_v1  ;;  %1131 = vmatprep.subr.bf16.mxu1 %v1365_v1 }
  0x38   :  { %1109 = vmatpush3.bf16.msra.mxu0 %v1441_v14  ;;  %1133 = vmatpush3.bf16.msra.mxu1 %v1441_v14 }
  0x39   :  { %1110 = vmatprep.subr.bf16.mxu0 %v1365_v1  ;;  %1134 = vmatprep.subr.bf16.mxu1 %v1365_v1 }
  0x3c   :  { %1112 = vmatpush3.bf16.msra.mxu0 %v1447_v17  ;;  %1136 = vmatpush3.bf16.msra.mxu1 %v1447_v17 }
  0x3d   :  { %1113 = vmatprep.subr.bf16.mxu0 %v1365_v1  ;;  %1137 = vmatprep.subr.bf16.mxu1 %v1365_v1 }
  0x40   :  { %1115 = vmatpush3.bf16.msra.mxu0 %v1453_v20  ;;  %1139 = vmatpush3.bf16.msra.mxu1 %v1453_v20 }
  0x41   :  { %1116 = vmatprep.subr.bf16.mxu0 %v1365_v1  ;;  %1140 = vmatprep.subr.bf16.mxu1 %v1365_v1 }
  0x44   :  { %1118 = vmatpush3.bf16.msra.mxu0 %v1459_v23  ;;  %1142 = vmatpush3.bf16.msra.mxu1 %v1459_v23 }
  0x45   :  { %1119 = vmatprep.subr.bf16.mxu0 %v1365_v1  ;;  %1143 = vmatprep.subr.bf16.mxu1 %v1365_v1 }
  0x48   :  { %1121 = vmatpush3.bf16.msra.mxu0 %v1465_v26  ;;  %1145 = vmatpush3.bf16.msra.mxu1 %v1465_v26 }
  0x49   :  { %1146 = vmatprep.subr.bf16.mxu0 %v1365_v1  ;;  %1170 = vmatprep.subr.bf16.mxu1 %v1365_v1 }
  0x4b   :  { %851 = vmatmul.mubr.f32.vlgmr.msra.gmra.mrb[0].mxu0 %v1367_v2 }
  0x4c   :  { %1148 = vmatpush3.bf16.msra.mxu0 %v1426_v6  ;;  %920 = vmatprep.mubr.msk.f32.mxu0 %vm1366_vm0, %v1367_v2 }
  0x4d   :  { %1149 = vmatprep.subr.bf16.mxu0 %v1365_v1 }
  0x50   :  { %1151 = vmatpush3.bf16.msra.mxu0 %v1429_v8 }
  0x51   :  { %1152 = vmatprep.subr.bf16.mxu0 %v1365_v1 }
  0x54   :  { %1154 = vmatpush3.bf16.msra.mxu0 %v1435_v11 }
  0x55   :  { %1155 = vmatprep.subr.bf16.mxu0 %v1365_v1 }
  0x58   :  { %1157 = vmatpush3.bf16.msra.mxu0 %v1441_v14 }
  0x59   :  { %1158 = vmatprep.subr.bf16.mxu0 %v1365_v1 }
  0x5c   :  { %1160 = vmatpush3.bf16.msra.mxu0 %v1447_v17 }
  0x5d   :  { %1161 = vmatprep.subr.bf16.mxu0 %v1365_v1 }
  0x60   :  { %1163 = vmatpush3.bf16.msra.mxu0 %v1453_v20 }
  0x61   :  { %1164 = vmatprep.subr.bf16.mxu0 %v1365_v1 }
  0x64   :  { %1166 = vmatpush3.bf16.msra.mxu0 %v1459_v23 }
  0x65   :  { %1167 = vmatprep.subr.bf16.mxu0 %v1365_v1 }
  0x68   :  { %1169 = vmatpush3.bf16.msra.mxu0 %v1465_v26 }
  0x69   :  { %1194 = vmatprep.subr.bf16.mxu0 %v1365_v1 }
 0x11e   :  { %v130_v28 = vpop.f32.mrb[0].mxu0 }
 0x11f   :  { %v134_v29 = vadd.f32 %v130_v28, %v63_v27  ;;  %v852_v30 = vpop.f32.mrb[1].mxu0 }
 0x121   :  { %1297 = vtanh.f32 %v134_v29 }
 0x12b   :  { %v1298_v31 = vpop.eup %1297 }
 0x12c   :  { %886 = vmatmul.mubr.f32.vlgmr.msra.gmra.mrb[0].mxu1 %v1298_v31 }
 0x12d   :  { %1172 = vmatpush3.bf16.msra.mxu1 %v1426_v6  ;;  %955 = vmatprep.mubr.msk.f32.mxu1 %vm1366_vm0, %v1367_v2 }
 0x12e   :  { %1173 = vmatprep.subr.bf16.mxu1 %v1365_v1 }
 0x131   :  { %1175 = vmatpush3.bf16.msra.mxu1 %v1429_v8 }
 0x132   :  { %1176 = vmatprep.subr.bf16.mxu1 %v1365_v1 }
 0x135   :  { %1178 = vmatpush3.bf16.msra.mxu1 %v1435_v11 }
 0x136   :  { %1179 = vmatprep.subr.bf16.mxu1 %v1365_v1 }
 0x139   :  { %1181 = vmatpush3.bf16.msra.mxu1 %v1441_v14 }
 0x13a   :  { %1182 = vmatprep.subr.bf16.mxu1 %v1365_v1 }
 0x13d   :  { %1184 = vmatpush3.bf16.msra.mxu1 %v1447_v17 }
 0x13e   :  { %1185 = vmatprep.subr.bf16.mxu1 %v1365_v1 }
 0x141   :  { %1187 = vmatpush3.bf16.msra.mxu1 %v1453_v20 }
 0x142   :  { %1188 = vmatprep.subr.bf16.mxu1 %v1365_v1 }
 0x145   :  { %1190 = vmatpush3.bf16.msra.mxu1 %v1459_v23 }
 0x146   :  { %1191 = vmatprep.subr.bf16.mxu1 %v1365_v1 }
 0x149   :  { %1193 = vmatpush3.bf16.msra.mxu1 %v1465_v26 }
 0x14a   :  { %1218 = vmatprep.subr.bf16.mxu1 %v1365_v1 }
 0x1ff   :  { %v204_v33 = vpop.f32.mrb[0].mxu1 }
 0x200   :  { %v208_v34 = vadd.f32 %v204_v33, %v137_v32  ;;  %v887_v35 = vpop.f32.mrb[1].mxu1 }
 0x202   :  { %1299 = vtanh.f32 %v208_v34 }
 0x20c   :  { %v1300_v36 = vpop.eup %1299 }
 0x20d   :  { %921 = vmatmul.mubr.f32.vlgmr.msra.gmra.mrb[2].mxu0 %v1300_v36 }
 0x20e   :  { %1196 = vmatpush3.bf16.msra.mxu0 %v1426_v6  ;;  %990 = vmatprep.mubr.msk.f32.mxu0 %vm1366_vm0, %v1367_v2 }
 0x20f   :  { %1197 = vmatprep.subr.bf16.mxu0 %v1365_v1 }
 0x212   :  { %1199 = vmatpush3.bf16.msra.mxu0 %v1429_v8 }
 0x213   :  { %1200 = vmatprep.subr.bf16.mxu0 %v1365_v1 }
 0x216   :  { %1202 = vmatpush3.bf16.msra.mxu0 %v1435_v11 }
 0x217   :  { %1203 = vmatprep.subr.bf16.mxu0 %v1365_v1 }
 0x21a   :  { %1205 = vmatpush3.bf16.msra.mxu0 %v1441_v14 }
 0x21b   :  { %1206 = vmatprep.subr.bf16.mxu0 %v1365_v1 }
 0x21e   :  { %1208 = vmatpush3.bf16.msra.mxu0 %v1447_v17 }
 0x21f   :  { %1209 = vmatprep.subr.bf16.mxu0 %v1365_v1 }
 0x222   :  { %1211 = vmatpush3.bf16.msra.mxu0 %v1453_v20 }
 0x223   :  { %1212 = vmatprep.subr.bf16.mxu0 %v1365_v1 }
 0x226   :  { %1214 = vmatpush3.bf16.msra.mxu0 %v1459_v23 }
 0x227   :  { %1215 = vmatprep.subr.bf16.mxu0 %v1365_v1 }
 0x22a   :  { %1217 = vmatpush3.bf16.msra.mxu0 %v1465_v26 }
 0x22b   :  { %1242 = vmatprep.subr.bf16.mxu0 %v1365_v1 }
 0x2e0   :  { %v278_v38 = vpop.f32.mrb[2].mxu0 }
 0x2e1   :  { %v282_v39 = vadd.f32 %v278_v38, %v211_v37  ;;  %v922_v40 = vpop.f32.mrb[3].mxu0 }
 0x2e3   :  { %1301 = vtanh.f32 %v282_v39 }
 0x2ed   :  { %v1302_v41 = vpop.eup %1301 }
 0x2ee   :  { %956 = vmatmul.mubr.f32.vlgmr.msra.gmra.mrb[2].mxu1 %v1302_v41 }
 0x2ef   :  { %1220 = vmatpush3.bf16.msra.mxu1 %v1426_v6  ;;  %1025 = vmatprep.mubr.msk.f32.mxu1 %vm1366_vm0, %v1367_v2 }
 0x2f0   :  { %1221 = vmatprep.subr.bf16.mxu1 %v1365_v1 }
 0x2f3   :  { %1223 = vmatpush3.bf16.msra.mxu1 %v1429_v8 }
 0x2f4   :  { %1224 = vmatprep.subr.bf16.mxu1 %v1365_v1 }
 0x2f7   :  { %1226 = vmatpush3.bf16.msra.mxu1 %v1435_v11 }
 0x2f8   :  { %1227 = vmatprep.subr.bf16.mxu1 %v1365_v1 }
 0x2fb   :  { %1229 = vmatpush3.bf16.msra.mxu1 %v1441_v14 }
 0x2fc   :  { %1230 = vmatprep.subr.bf16.mxu1 %v1365_v1 }
 0x2ff   :  { %1232 = vmatpush3.bf16.msra.mxu1 %v1447_v17 }
 0x300   :  { %1233 = vmatprep.subr.bf16.mxu1 %v1365_v1 }
 0x303   :  { %1235 = vmatpush3.bf16.msra.mxu1 %v1453_v20 }
 0x304   :  { %1236 = vmatprep.subr.bf16.mxu1 %v1365_v1 }
 0x307   :  { %1238 = vmatpush3.bf16.msra.mxu1 %v1459_v23 }
 0x308   :  { %1239 = vmatprep.subr.bf16.mxu1 %v1365_v1 }
 0x30b   :  { %1241 = vmatpush3.bf16.msra.mxu1 %v1465_v26 }
 0x30c   :  { %1266 = vmatprep.subr.bf16.mxu1 %v1365_v1 }
 0x3c1   :  { %v352_v43 = vpop.f32.mrb[2].mxu1 }
 0x3c2   :  { %v356_v44 = vadd.f32 %v352_v43, %v285_v42  ;;  %v957_v45 = vpop.f32.mrb[3].mxu1 }
 0x3c4   :  { %1303 = vtanh.f32 %v356_v44 }
 0x3ce   :  { %v1304_v46 = vpop.eup %1303 }
 0x3cf   :  { %991 = vmatmul.mubr.f32.vlgmr.msra.gmra.mrb[4].mxu0 %v1304_v46 }
 0x3d0   :  { %1244 = vmatpush3.bf16.msra.mxu0 %v1426_v6  ;;  %1060 = vmatprep.mubr.msk.f32.mxu0 %vm1366_vm0, %v1367_v2 }
 0x3d1   :  { %1245 = vmatprep.subr.bf16.mxu0 %v1365_v1 }
 0x3d4   :  { %1247 = vmatpush3.bf16.msra.mxu0 %v1429_v8 }
 0x3d5   :  { %1248 = vmatprep.subr.bf16.mxu0 %v1365_v1 }
 0x3d8   :  { %1250 = vmatpush3.bf16.msra.mxu0 %v1435_v11 }
 0x3d9   :  { %1251 = vmatprep.subr.bf16.mxu0 %v1365_v1 }
 0x3dc   :  { %1253 = vmatpush3.bf16.msra.mxu0 %v1441_v14 }
 0x3dd   :  { %1254 = vmatprep.subr.bf16.mxu0 %v1365_v1 }
 0x3e0   :  { %1256 = vmatpush3.bf16.msra.mxu0 %v1447_v17 }
 0x3e1   :  { %1257 = vmatprep.subr.bf16.mxu0 %v1365_v1 }
 0x3e4   :  { %1259 = vmatpush3.bf16.msra.mxu0 %v1453_v20 }
 0x3e5   :  { %1260 = vmatprep.subr.bf16.mxu0 %v1365_v1 }
 0x3e8   :  { %1262 = vmatpush3.bf16.msra.mxu0 %v1459_v23 }
 0x3e9   :  { %1263 = vmatprep.subr.bf16.mxu0 %v1365_v1 }
 0x3ec   :  { %1265 = vmatpush3.bf16.msra.mxu0 %v1465_v26 }
 0x4a2   :  { %v426_v48 = vpop.f32.mrb[4].mxu0 }
 0x4a3   :  { %v430_v49 = vadd.f32 %v426_v48, %v359_v47  ;;  %v992_v50 = vpop.f32.mrb[5].mxu0 }
 0x4a5   :  { %1305 = vtanh.f32 %v430_v49 }
 0x4af   :  { %v1306_v51 = vpop.eup %1305 }
 0x4b0   :  { %1026 = vmatmul.mubr.f32.vlgmr.msra.gmra.mrb[4].mxu1 %v1306_v51 }
 0x4b1   :  { %1268 = vmatpush3.bf16.msra.mxu1 %v1426_v6  ;;  %1095 = vmatprep.mubr.msk.f32.mxu1 %vm1366_vm0, %v1367_v2  ;;  %v680_v2 = vld [vmem:[%s1589_s2] ss:$0 sm:$0xff] }
 0x4b2   :  { %1269 = vmatprep.subr.bf16.mxu1 %v1365_v1 }
 0x4b5   :  { %1271 = vmatpush3.bf16.msra.mxu1 %v1429_v8 }
 0x4b6   :  { %1272 = vmatprep.subr.bf16.mxu1 %v1365_v1 }
 0x4b9   :  { %1274 = vmatpush3.bf16.msra.mxu1 %v1435_v11 }
 0x4ba   :  { %1275 = vmatprep.subr.bf16.mxu1 %v1365_v1 }
 0x4bd   :  { %1277 = vmatpush3.bf16.msra.mxu1 %v1441_v14 }
 0x4be   :  { %1278 = vmatprep.subr.bf16.mxu1 %v1365_v1 }
 0x4c1   :  { %1280 = vmatpush3.bf16.msra.mxu1 %v1447_v17 }
 0x4c2   :  { %1281 = vmatprep.subr.bf16.mxu1 %v1365_v1 }
 0x4c5   :  { %1283 = vmatpush3.bf16.msra.mxu1 %v1453_v20 }
 0x4c6   :  { %1284 = vmatprep.subr.bf16.mxu1 %v1365_v1 }
 0x4c9   :  { %1286 = vmatpush3.bf16.msra.mxu1 %v1459_v23 }
 0x4ca   :  { %1287 = vmatprep.subr.bf16.mxu1 %v1365_v1 }
 0x4cd   :  { %1289 = vmatpush3.bf16.msra.mxu1 %v1465_v26 }
 0x583   :  { %v500_v53 = vpop.f32.mrb[4].mxu1 }
 0x584   :  { %v504_v54 = vadd.f32 %v500_v53, %v433_v52  ;;  %v1027_v55 = vpop.f32.mrb[5].mxu1 }
 0x586   :  { %1307 = vtanh.f32 %v504_v54 }
 0x590   :  { %v1308_v56 = vpop.eup %1307 }
 0x591   :  { %1061 = vmatmul.mubr.f32.vlgmr.msra.gmra.mrb[6].mxu0 %v1308_v56 }
 0x664   :  { %v574_v58 = vpop.f32.mrb[6].mxu0 }
 0x665   :  { %v578_v59 = vadd.f32 %v574_v58, %v507_v57  ;;  %v1062_v60 = vpop.f32.mrb[7].mxu0 }
 0x667   :  { %1309 = vtanh.f32 %v578_v59 }
 0x671   :  { %v1310_v61 = vpop.eup %1309 }
 0x672   :  { %1096 = vmatmul.mubr.f32.vlgmr.msra.gmra.mrb[6].mxu1 %v1310_v61 }
 0x745   :  { %v648_v63 = vpop.f32.mrb[6].mxu1 }
 0x746   :  { %v652_v0 = vadd.f32 %v648_v63, %v581_v62  ;;  %v1097_v1 = vpop.f32.mrb[7].mxu1 }
 0x748   :  { %1311 = vtanh.f32 %v652_v0 }
 0x752   :  { %v1312_v3 = vpop.eup %1311 }
 0x753   :  { %v661_v4 = vmul.f32 %v1312_v3, %v680_v2 }
 0x755   :  { %662 = vadd.xlane.f32.xlu0 %v661_v4 }
 0x7e2   :  { %v663_v6 = vpop.xlane.xlu0 %662 }
 0x7e3   :  { %v671_v7 = vadd.f32 %v681_v5, %v663_v6 }
 0x7e5   :  { %673 = vst.msk [vmem:[%s1591_s4] sm:$0xff] %vm672_vm1, %v671_v7 }
 0x7e6   :  { %678 = vsyncpa [#allocation4], 1 }
 0x7e7   :  { %679 = vsyncpa [#allocation6], 1 }

</bundles_post_ra>
